<compile_context>
chip_gen: v5e
topology: v5e:2x2
jax: 0.10.0
libtpu: 0.0.40
codegen_flags: <defaults>
</compile_context>

<pallas_src>
import functools

import jax
import jax.numpy as jnp
from jax.experimental import pallas as pl
from jax.experimental.pallas import tpu as pltpu


def _round_up(x, m):
    return ((x + m - 1) // m) * m


def _activate(y, nl, slope):
    if nl == "relu":
        return jnp.maximum(y, 0.0)
    if nl == "leakyrelu":
        return jnp.where(y >= 0.0, y, slope * y)
    if nl == "tanh":
        return jnp.tanh(y)
    if nl == "sigmoid":
        return jax.nn.sigmoid(y)
    return y  # 'none'


def _smlp_kernel(x_ref, w_ref, scale_ref, shift_ref, o_ref, *, nl, slope):
    """Single-K step: (tm, ic) @ (ic, tn) -> *scale + shift -> activation."""
    y = jnp.dot(x_ref[...], w_ref[...], preferred_element_type=jnp.float32)
    y = y * scale_ref[...] + shift_ref[...]
    o_ref[...] = _activate(y, nl, slope).astype(o_ref.dtype)


def _smlp_kernel_ktiled(x_ref, w_ref, scale_ref, shift_ref, o_ref, acc_ref,
                        *, nl, slope):
    """K-tiled variant (large ic): f32 accumulator with init/finalize."""
    k = pl.program_id(2)

    @pl.when(k == 0)
    def _():
        acc_ref[...] = jnp.zeros_like(acc_ref)

    acc_ref[...] += jnp.dot(x_ref[...], w_ref[...],
                            preferred_element_type=jnp.float32)

    @pl.when(k == pl.num_programs(2) - 1)
    def _():
        y = acc_ref[...] * scale_ref[...] + shift_ref[...]
        o_ref[...] = _activate(y, nl, slope).astype(o_ref.dtype)


def _vmem_budget_bytes():
    """~75% of physical VMEM (v5e/v6e: 128 MiB -> 96 MiB, v7x: 64 -> 48)."""
    cap = None
    try:
        cap = int(pltpu.get_tpu_info().vmem_capacity_bytes)
    except Exception:
        cap = None
    if not cap or cap <= 0:
        cap = 64 * 1024 * 1024  # conservative (v7x physical)
    return max(16 * 1024 * 1024, (cap * 3) // 4)


def smlp_forward(
    x,              # (B, N, ic) float32
    conv_w,         # (oc, ic, 1, 1) float32 -- Conv2d(k=1, bias=False) weight
    bn_gamma,       # (oc,)
    bn_beta,        # (oc,)
    bn_mean,        # (oc,) running mean
    bn_var,         # (oc,) running var
    *,
    is_bn=True,
    nl="leakyrelu",
    slope=0.1,
    eps=1e-5,
    tm=2048,        # requested row tile; capped/budgeted below
    max_tk=512,     # K (ic) tile cap; tiling only kicks in when ic > max_tk
    max_tn=512,     # N (oc) tile cap; tiling only kicks in when oc > max_tn
    out_dtype=None, # e.g. jnp.bfloat16 halves the dominant HBM writeback
):
    assert nl in ("none", "relu", "leakyrelu", "tanh", "sigmoid")
    B, N, ic = x.shape
    oc = conv_w.shape[0]
    M = B * N
    out_dtype = x.dtype if out_dtype is None else out_dtype
    slope_f = float(slope) if slope is not None else 0.0

    # ---- BN (eval-mode running stats) as a per-output-channel affine.
    # TODO(synk): PyTorch train-mode BN (batch statistics + running-stat
    # updates) is not reproduced; only eval-mode semantics are implemented.
    if is_bn:
        scale = (bn_gamma / jnp.sqrt(bn_var + eps)).astype(jnp.float32)
        shift = (bn_beta - bn_mean * scale).astype(jnp.float32)
    else:
        scale = jnp.ones((oc,), jnp.float32)
        shift = jnp.zeros((oc,), jnp.float32)
    scale = scale.reshape(1, oc)
    shift = shift.reshape(1, oc)

    # Weight as (ic, oc); raw (unfolded) weight goes to the MXU.
    w = conv_w.reshape(oc, ic).T.astype(x.dtype)
    x2d = x.reshape(M, ic)  # metadata-only reshape, no HBM pass

    # ---- Channel tiling (only for large ic/oc; small layers keep the full
    # extent, which is layout-legal and needs zero channel padding).
    tn = oc
    if oc > max_tn:
        tn = max(128, (max_tn // 128) * 128)  # ragged last N block: masked, safe
    n_tiles = pl.cdiv(oc, tn)

    tk = ic
    if ic > max_tk:
        cand = (max_tk // 128) * 128
        while cand >= 128 and ic % cand != 0:
            cand -= 128  # a ragged K block would accumulate garbage -> need tk | ic
        if cand >= 128:
            tk = cand
    k_tiles = ic // tk

    # ---- Row tile selection under the (generation-aware) VMEM budget.
    x_isz = jnp.dtype(x2d.dtype).itemsize
    o_isz = jnp.dtype(out_dtype).itemsize

    def _tile_bytes(r, c, itemsize):  # VMEM tile incl. (8,128) layout padding
        return _round_up(max(r, 1), 8) * _round_up(max(c, 1), 128) * itemsize

    def _vmem_estimate(t):
        est = (2 * _tile_bytes(t, tk, x_isz)       # x row tiles (double-buffered)
               + 2 * _tile_bytes(tk, tn, x_isz)    # weight tile
               + 2 * 2 * _tile_bytes(1, tn, 4)     # BN scale + shift
               + 2 * _tile_bytes(t, tn, o_isz))    # output tiles (double-buffered)
        if k_tiles > 1:
            est += _tile_bytes(t, tn, 4)           # f32 accumulator scratch
        return est

    vmem_budget = _vmem_budget_bytes()

    tm_eff = max(8, _round_up(min(int(tm), M), 8))
    # Keep >=4 row steps so the grid pipelines (and splits across v7x's two
    # TensorCores) but never shrink the tile below 256 rows just for that.
    tm_eff = min(tm_eff, max(256, _round_up(pl.cdiv(M, 4), 8)))
    while tm_eff > 8 and _vmem_estimate(tm_eff) > vmem_budget:
        tm_eff = max(8, _round_up(tm_eff // 2, 8))
    if tm_eff >= M:
        tm_eff = M  # single full-extent row block (always layout-legal)
    rows = pl.cdiv(M, tm_eff)

    vmem_limit = int(min(vmem_budget,
                         max(int(1.25 * _vmem_estimate(tm_eff)),
                             16 * 1024 * 1024)))

    cost = pl.CostEstimate(
        flops=2 * M * ic * oc,
        transcendentals=(M * oc) if nl in ("tanh", "sigmoid") else 0,
        bytes_accessed=(M * ic * x_isz + ic * oc * x_isz + 2 * oc * 4
                        + M * oc * o_isz),
    )

    if k_tiles == 1:
        kernel = functools.partial(_smlp_kernel, nl=nl, slope=slope_f)
        grid = (rows, n_tiles)
        in_specs = [
            pl.BlockSpec((tm_eff, ic), lambda i, j: (i, 0)),   # x row tile
            pl.BlockSpec((ic, tn), lambda i, j: (0, j)),       # weight
            pl.BlockSpec((1, tn), lambda i, j: (0, j)),        # BN scale
            pl.BlockSpec((1, tn), lambda i, j: (0, j)),        # BN shift
        ]
        out_specs = pl.BlockSpec((tm_eff, tn), lambda i, j: (i, j))
        scratch = []
        semantics = ("parallel", "parallel")
    else:
        kernel = functools.partial(_smlp_kernel_ktiled, nl=nl, slope=slope_f)
        grid = (rows, n_tiles, k_tiles)                        # reduction last
        in_specs = [
            pl.BlockSpec((tm_eff, tk), lambda i, j, k: (i, k)),
            pl.BlockSpec((tk, tn), lambda i, j, k: (k, j)),
            pl.BlockSpec((1, tn), lambda i, j, k: (0, j)),
            pl.BlockSpec((1, tn), lambda i, j, k: (0, j)),
        ]
        out_specs = pl.BlockSpec((tm_eff, tn), lambda i, j, k: (i, j))
        scratch = [pltpu.VMEM((tm_eff, tn), jnp.float32)]
        semantics = ("parallel", "parallel", "arbitrary")

    out2d = pl.pallas_call(
        kernel,
        out_shape=jax.ShapeDtypeStruct((M, oc), out_dtype),
        grid_spec=pltpu.PrefetchScalarGridSpec(
            num_scalar_prefetch=0,
            grid=grid,
            in_specs=in_specs,
            out_specs=out_specs,
            scratch_shapes=scratch,
        ),
        compiler_params=pltpu.CompilerParams(
            dimension_semantics=semantics,
            vmem_limit_bytes=vmem_limit,
        ),
        cost_estimate=cost,
    )(x2d, w, scale, shift)

    return out2d.reshape(B, N, oc)


def smlp_reference(x, conv_w, bn_gamma, bn_beta, bn_mean, bn_var,
                   *, is_bn=True, nl="leakyrelu", slope=0.1, eps=1e-5):
    """Pure-JAX reference mirroring the PyTorch forward (eval-mode BN)."""
    oc, ic = conv_w.shape[0], conv_w.shape[1]
    w = conv_w.reshape(oc, ic)
    y = jnp.einsum("bnc,oc->bno", x, w)
    if is_bn:
        scale = bn_gamma / jnp.sqrt(bn_var + eps)
        shift = bn_beta - bn_mean * scale
        y = y * scale + shift
    if nl == "relu":
        y = jnp.maximum(y, 0.0)
    elif nl == "leakyrelu":
        y = jnp.where(y >= 0.0, y, slope * y)
    elif nl == "tanh":
        y = jnp.tanh(y)
    elif nl == "sigmoid":
        y = jax.nn.sigmoid(y)
    return y


if __name__ == "__main__":
    key = jax.random.PRNGKey(0)
    ks = jax.random.split(key, 8)

    def bf16_exact(a):
        # Round through bf16 so any MXU input truncation is lossless and the
        # kernel/reference comparison is precision-mode independent.
        return a.astype(jnp.bfloat16).astype(jnp.float32)

    # ---- Test 1: B=2, N=16 points, ic=4, oc=32; BN + leakyrelu.  tm forced to
    # 8 so the row grid has 4 steps (exercises multi-tile pipelining).
    B, N, IC, OC = 2, 16, 4, 32
    x = bf16_exact(jax.random.normal(ks[0], (B, N, IC), dtype=jnp.float32))
    conv_w = bf16_exact(0.1 * jax.random.normal(ks[1], (OC, IC, 1, 1),
                                                dtype=jnp.float32))
    bn_gamma = 1.0 + 0.1 * jax.random.normal(ks[2], (OC,), dtype=jnp.float32)
    bn_beta = 0.1 * jax.random.normal(ks[3], (OC,), dtype=jnp.float32)
    bn_mean = 0.1 * jax.random.normal(ks[4], (OC,), dtype=jnp.float32)
    bn_var = jnp.abs(1.0 + 0.1 * jax.random.normal(ks[5], (OC,),
                                                   dtype=jnp.float32))

    out = smlp_forward(x, conv_w, bn_gamma, bn_beta, bn_mean, bn_var,
                       is_bn=True, nl="leakyrelu", slope=0.1, tm=8)
    out = jax.block_until_ready(out)
    ref = smlp_reference(x, conv_w, bn_gamma, bn_beta, bn_mean, bn_var,
                         is_bn=True, nl="leakyrelu", slope=0.1)
    assert out.shape == (B, N, OC)
    assert jnp.allclose(out, ref, atol=1e-5, rtol=1e-5), "mismatch (test 1)"

    # ---- Test 2: ragged row count (M=30, not a multiple of 8), no BN, tanh
    # (transcendental).  Slightly relaxed tolerance: EUP tanh vs XLA tanh.
    B2, N2 = 3, 10
    x2 = bf16_exact(jax.random.normal(ks[6], (B2, N2, IC), dtype=jnp.float32))
    out2 = smlp_forward(x2, conv_w, bn_gamma, bn_beta, bn_mean, bn_var,
                        is_bn=False, nl="tanh", slope=None)
    out2 = jax.block_until_ready(out2)
    ref2 = smlp_reference(x2, conv_w, bn_gamma, bn_beta, bn_mean, bn_var,
                          is_bn=False, nl="tanh", slope=None)
    assert out2.shape == (B2, N2, OC)
    assert jnp.allclose(out2, ref2, atol=1e-4, rtol=1e-4), "mismatch (test 2)"

    # ---- Test 3: larger channel counts with forced K/N tiling (ic=256 -> 2 K
    # tiles, oc=384 -> 3 N tiles) to exercise the accumulator path.
    B3, N3, IC3, OC3 = 2, 64, 256, 384
    x3 = bf16_exact(jax.random.normal(ks[7], (B3, N3, IC3), dtype=jnp.float32))
    w3 = bf16_exact(0.05 * jax.random.normal(ks[1], (OC3, IC3, 1, 1),
                                             dtype=jnp.float32))
    g3 = 1.0 + 0.1 * jax.random.normal(ks[2], (OC3,), dtype=jnp.float32)
    b3 = 0.1 * jax.random.normal(ks[3], (OC3,), dtype=jnp.float32)
    m3 = 0.1 * jax.random.normal(ks[4], (OC3,), dtype=jnp.float32)
    v3 = jnp.abs(1.0 + 0.1 * jax.random.normal(ks[5], (OC3,),
                                               dtype=jnp.float32))
    out3 = smlp_forward(x3, w3, g3, b3, m3, v3, is_bn=True, nl="relu",
                        slope=None, max_tk=128, max_tn=128)
    out3 = jax.block_until_ready(out3)
    ref3 = smlp_reference(x3, w3, g3, b3, m3, v3, is_bn=True, nl="relu",
                          slope=None)
    assert out3.shape == (B3, N3, OC3)
    assert jnp.allclose(out3, ref3, atol=1e-4, rtol=1e-4), "mismatch (test 3)"

    print("KERNEL_OK")
</pallas_src>

<mosaic_0001>
module attributes {stable_mosaic.version = 11 : i64} {
  func.func @_smlp_kernel(%arg0: i32, %arg1: i32, %arg2: memref<8x4xf32, #tpu.memory_space<vmem>>, %arg3: memref<4x32xf32, #tpu.memory_space<vmem>>, %arg4: memref<1x32xf32, #tpu.memory_space<vmem>>, %arg5: memref<1x32xf32, #tpu.memory_space<vmem>>, %arg6: memref<8x32xf32, #tpu.memory_space<vmem>>) attributes {dimension_semantics = [#tpu.dimension_semantics<parallel>, #tpu.dimension_semantics<parallel>], iteration_bounds = array<i64: 4, 1>, scalar_prefetch = 0 : i64, scratch_operands = 0 : i64, tpu.core_type = #tpu.core_type<tc>, window_params = [{transform_indices = @transform_0, window_bounds = array<i64: 8, 4>}, {transform_indices = @transform_1, window_bounds = array<i64: 4, 32>}, {transform_indices = @transform_2, window_bounds = array<i64: 1, 32>}, {transform_indices = @transform_3, window_bounds = array<i64: 1, 32>}, {transform_indices = @transform_4, window_bounds = array<i64: 8, 32>}]} {
    %c0 = arith.constant 0 : index
    %c0_0 = arith.constant 0 : index
    %0 = vector.load %arg2[%c0, %c0_0] : memref<8x4xf32, #tpu.memory_space<vmem>>, vector<8x4xf32>
    %c0_1 = arith.constant 0 : index
    %c0_2 = arith.constant 0 : index
    %1 = vector.load %arg3[%c0_1, %c0_2] : memref<4x32xf32, #tpu.memory_space<vmem>>, vector<4x32xf32>
    %cst = arith.constant dense<0.000000e+00> : vector<8x32xf32>
    %2 = tpu.matmul %0, %1, %cst {dimension_numbers = #tpu.dot_dimension_numbers<[1], [0], [0], [1], [0, 0, 1, 1], [], []>} : vector<8x4xf32>, vector<4x32xf32>, vector<8x32xf32> -> vector<8x32xf32>
    %c0_3 = arith.constant 0 : index
    %c0_4 = arith.constant 0 : index
    %3 = vector.load %arg4[%c0_3, %c0_4] : memref<1x32xf32, #tpu.memory_space<vmem>>, vector<1x32xf32>
    %4 = vector.broadcast %3 : vector<1x32xf32> to vector<8x32xf32>
    %5 = arith.mulf %2, %4 : vector<8x32xf32>
    %c0_5 = arith.constant 0 : index
    %c0_6 = arith.constant 0 : index
    %6 = vector.load %arg5[%c0_5, %c0_6] : memref<1x32xf32, #tpu.memory_space<vmem>>, vector<1x32xf32>
    %7 = vector.broadcast %6 : vector<1x32xf32> to vector<8x32xf32>
    %8 = arith.addf %5, %7 : vector<8x32xf32>
    %cst_7 = arith.constant 0.000000e+00 : f32
    %9 = vector.broadcast %cst_7 : f32 to vector<8x32xf32>
    %10 = arith.cmpf oge, %8, %9 : vector<8x32xf32>
    %cst_8 = arith.constant 1.000000e-01 : f32
    %11 = vector.broadcast %cst_8 : f32 to vector<8x32xf32>
    %12 = arith.mulf %11, %8 : vector<8x32xf32>
    %13 = arith.select %10, %8, %12 : vector<8x32xi1>, vector<8x32xf32>
    %c0_9 = arith.constant 0 : index
    %c0_10 = arith.constant 0 : index
    %14 = vector.load %arg6[%c0_9, %c0_10] : memref<8x32xf32, #tpu.memory_space<vmem>>, vector<8x32xf32>
    tpu.vector_store %arg6[%c0_9, %c0_10], %13 {strides = array<i32>} : memref<8x32xf32, #tpu.memory_space<vmem>>, vector<8x32xf32>,
    return
  }
  func.func @transform_0(%arg0: i32, %arg1: i32) -> (i32, i32) {
    %c0_i32 = arith.constant 0 : i32
    %c0_i32_0 = arith.constant 0 : i32
    return %arg0, %c0_i32 : i32, i32
  }
  func.func @transform_1(%arg0: i32, %arg1: i32) -> (i32, i32) {
    %c0_i32 = arith.constant 0 : i32
    %c0_i32_0 = arith.constant 0 : i32
    return %c0_i32, %arg1 : i32, i32
  }
  func.func @transform_2(%arg0: i32, %arg1: i32) -> (i32, i32) {
    %c0_i32 = arith.constant 0 : i32
    %c0_i32_0 = arith.constant 0 : i32
    return %c0_i32, %arg1 : i32, i32
  }
  func.func @transform_3(%arg0: i32, %arg1: i32) -> (i32, i32) {
    %c0_i32 = arith.constant 0 : i32
    %c0_i32_0 = arith.constant 0 : i32
    return %c0_i32, %arg1 : i32, i32
  }
  func.func @transform_4(%arg0: i32, %arg1: i32) -> (i32, i32) {
    %c0_i32 = arith.constant 0 : i32
    return %arg0, %arg1 : i32, i32
  }
}

</mosaic_0001>

<bundles_post_ra>
// kernel: tpu_custom_call.1
= control target key start
LH: loop header
LB: loop body
LE: loop exit
PB: predicated region body
PF: predicated region fallthrough
CT: control target
= control target key end

     0   :  { %9 = vsyncpa [#allocation3], 0  ;;  %s705_s0 = inlined_call_operand.vmem [shape: f32[32,4], index: 0, kind: input, shape index: {}]   ;;  %s706_s1 = inlined_call_operand.vmem [shape: f32[4,32], index: 1, kind: input, shape index: {}]   ;;  %s707_s2 = inlined_call_operand.vmem [shape: f32[1,32], index: 2, kind: input, shape index: {}]   ;;  %s708_s3 = inlined_call_operand.vmem [shape: f32[1,32], index: 3, kind: input, shape index: {}]   ;;  %s709_s4 = inlined_call_operand.hbm [shape: f32[32,32], index: 4, kind: output, shape index: {}]  }
   0x1   :  { %11 = vsyncpa [#allocation3 + $0x1], 0  ;;  %s599_s15 = smov 0   ;;  %s601_s16 = smov 0  }
   0x2   :  { %s603_s17 = smov 0   ;;  %s605_s18 = smov 0  }
   0x3   :  { %s607_s19 = smov 0   ;;  %s609_s20 = smov 0  }
   0x4 LB: > { %s421_s21 = sadd.s32 4294967295, %s572_s20   ;;  %s422_s22 = sadd.s32 4294967294, %s572_s20   ;;  %s572_s20 = sphi %s609_s20, %s17_s20   ;;  %s568_s19 = sphi %s607_s19, %s716_s19   ;;  %s564_s18 = sphi %s605_s18, %s715_s18   ;;  %s560_s17 = sphi %s603_s17, %s714_s17   ;;  %s556_s16 = sphi %s601_s16, %s713_s16   ;;  %s552_s15 = sphi %s599_s15, %s712_s15  }
   0x5   : > { %s29_s23 = sadd.s32 1, %s568_s19  ;;  %s142_s24 = sadd.s32 1, %s560_s17 }
   0x6   : > { %p31_p0 = scmp.ge.s32.totalorder %s29_s23, 4  ;;  %p152_p1 = scmp.ne.s32.totalorder %s560_s17, %s556_s16 }
   0x7   : > { %p153_p2 = scmp.eq.s32.totalorder %s421_s21, 3  ;;  %p158_p3 = scmp.ne.s32.totalorder %s556_s16, %s552_s15 }
   0x8   : > { %s718_s23 = smov (%p31_p0, %s29_s23), 0  ;;  %p159_p5 = scmp.eq.s32.totalorder %s422_s22, 3 }
   0x9   : > { %p639_p4 = por %p153_p2, %p152_p1  ;;  %s137_s26 = ssub.s32 %s568_s19, %s718_s23 }
   0xa   : > { %p428_p6 = scmp.ge.s32.totalorder %s572_s20, 1  ;;  %p140_p7 = scmp.eq.s32.totalorder %s137_s26, 0 }
   0xb   : > { %p646_p8 = por %p159_p5, %p158_p3  ;;  %p203_p9 = scmp.lt.s32.totalorder %s572_s20, 5 }
   0xc   : > { %s652_s28 = scalar_select %p140_p7, %s560_s17, %s142_s24  }
   0xd   : > { %p204_p10 = pnand %p428_p6, %p203_p9 }
   0xe   : > { %p238_p11 = scmp.lt.s32.totalorder (!%p204_p10), %s564_s18, 3  ;;  %s235_s10 = sand.u32 (!%p204_p10), 1, %s556_s16  }
   0xf   : > { %207 = sbr.rel (%p204_p10) target bundleno = 161 (0xa1), region = 36  ;;  %s429_s13 = sshll.u32 (!%p204_p10), %s235_s10, 3 }
  0x10   : > { %s434_s14 = sshll.u32 (!%p204_p10), %s564_s18, 3  ;;  %s237_s30 = scalar_lea.vmem (!%p204_p10), [#allocation2], %s429_s13 }
  0x11   : > { %s309_s29 = scalar_lea.hbm (!%p204_p10), %s709_s4, %s434_s14  ;;  %s514_s12 = scalar_lea.hbm (!%p204_p10), %s709_s4, 32 }
  0x14   : > { %v253_v0 = vld [vmem:[%s706_s1] sm:$0xf]  ;;  %vm258_vm0 = vcmask 1043456   ;;  %s239_s5 = scalar_select %p238_p11, %s564_s18, 3  ;;  %vm254_vm1 = vcmask 31744   ;;  %vm295_vm3 = vcmask 261120  }
  0x15   : > { %431 = vmatpush.msk.msra.mxu0 %vm258_vm0, %v253_v0  ;;  %v492_v2 = vld [vmem:[%s707_s2] ss:$0 sm:$0xff]  ;;  %s298_s18 = scalar_lea.sflag [#allocation3], %s235_s10 }
  0x16   : > { %s430_s6 = sshll.u32 %s239_s5, 3  ;;  %v493_v3 = vld [vmem:[%s708_s3] ss:$0 sm:$0xff]  ;;  %s311_s5 = sshll.u32 %s237_s30, 4  ;;  %s312_s5 = int_to_ptr.vmem [resolvable:$true] %s311_s5 }
  0x17   : > { %s241_s9 = scalar_lea.vmem %s705_s0, %s430_s6  ;;  %s313_s6 = sshll.u32 %s309_s29, 4  ;;  %s314_s6 = int_to_ptr.hbm [resolvable:$true] %s313_s6 }
  0x18   : > { %v252_v1 = vld [vmem:[%s241_s9] sm:$0xff]  ;;  %s508_s7 = sshra.s32 %s314_s6, 4  ;;  %s509_s7 = int_to_ptr.hbm [resolvable:$true] %s508_s7 }
  0x19   : > { %432 = vmatmul.msk.f32.vlgmr.msra.gmra.mxu0 %vm254_vm1, %v252_v1  ;;  %s510_s8 = scalar_lea.hbm %s509_s7, 8  ;;  %p515_p1 = scmp.lt.s32.totalorder %s509_s7, %s709_s4 }
  0x1a   : > { %p511_p12 = scmp.ne.s32.totalorder %s509_s7, %s510_s8  ;;  %p516_p2 = scmp.lt.s32.totalorder %s514_s12, %s510_s8 }
  0x1c   : > { %p512_p13 = pnand %p511_p12, %p639_p4  ;;  %p517_p3 = por %p516_p2, %p515_p1 }
  0x1e   : > { %p513_p0 = pneg %p512_p13 }
  0x20   : > { %p518_p5 = pnand %p517_p3, %p513_p0 }
  0x96   : > { %v279_v4 = vpop.f32.mrf.mxu0 }
  0x97   : > { %v286_v5 = vmul.f32 %v492_v2, %v279_v4 }
  0x99   : > { %v291_v6 = vadd.f32 %v493_v3, %v286_v5 }
  0x9b   : > { %vm292_vm2 = vcmp.ge.f32.partialorder %v291_v6, 0.0  ;;  %v293_v7 = vmul.f32 0.1, %v291_v6 }
  0x9d   : > { %v294_v8 = vsel %vm292_vm2, %v291_v6, %v293_v7 }
  0x9e   : > { %296 = vst.msk [vmem:[%s237_s30] sm:$0xff] %vm295_vm3, %v294_v8 }
  0x9f   : > { %521 = shalt.err (!%p518_p5)
}
  0xa0   : > { %437 = dma.vmem_to_hbm [thread:$0]  (%p639_p4), %s312_s5, 128, %s314_s6, %s298_s18  }
  0xa1 PF: > { %p443_p6 = scmp.ge.s32.totalorder %s572_s20, 2  ;;  %s325_s10 = sand.u32 1, %s552_s15  }
  0xa2   : > { %s326_s21 = scalar_lea.sflag [#allocation3], %s325_s10 }
  0xa3   : > { %p440_p7 = pnand %p443_p6, %p646_p8 }
  0xa5   : > { %p441_p9 = pneg %p440_p7 }
  0xa7   : > { %547 = dma.done.wait (%p441_p9), %s326_s21, 128  }
  0xa8   : > { %549 = vsyncadd (%p441_p9), %s326_s21, 4294967168  ;;  %s17_s20 = sadd.s32 1, %s572_s20   ;;  %s712_s15 = smov %s556_s16 }
  0xa9   : > { %p14_p10 = scmp.ge.s32.totalorder %s17_s20, 6   ;;  %s713_s16 = smov %s560_s17 }
  0xaa   : > { %s714_s17 = smov %s652_s28  ;;  %s715_s18 = smov %s568_s19 }
  0xab   : > { %s716_s19 = smov %s718_s23  ;;  %16 = sbr.rel (!%p14_p10) target bundleno = 4 (0x4), region = 80 }
  0xb0   :  { %332 = vsyncpa [#allocation3], 1 }
  0xb1   :  { %334 = vsyncpa [#allocation3 + $0x1], 1 }

</bundles_post_ra>
